<compile_context>
chip_gen: v6e
topology: v6e:2x2x1
jax: 0.10.0
libtpu: 0.0.40
codegen_flags: <defaults>
</compile_context>

<pallas_src>
import functools

import jax
import jax.numpy as jnp
import numpy as np
from jax.experimental import pallas as pl
from jax.experimental.pallas import tpu as pltpu


def _round_up(n, m):
    return ((n + m - 1) // m) * m


# ---------------------------------------------------------------------------
# Kernel
# ---------------------------------------------------------------------------
def dcn_kernel(x_ref, m_ref, v_ref, out_ref, *, dims):
    D, H1, H2, L = dims["D"], dims["H1"], dims["H2"], dims["L"]
    w2_off = dims["w2_off"]
    b1_off, b2_off, cb_off = dims["b1_off"], dims["b2_off"], dims["cb_off"]
    k_offs, wc_off, wd_off = dims["k_offs"], dims["wc_off"], dims["wd_off"]

    x = x_ref[...]                                  # (TB, D), f32 or bf16
    xf = x.astype(jnp.float32)                      # upcast once for CrossNet
    xm = x.astype(m_ref.dtype)                      # DNN MXU input dtype

    # ---- DNN branch: Linear -> ReLU -> Linear -> ReLU (f32 accumulation) ----
    w1 = m_ref[0:D, 0:H1]                           # (D, H1)
    b1 = v_ref[b1_off:b1_off + 1, 0:H1]             # (1, H1) f32
    h = jnp.dot(xm, w1, preferred_element_type=jnp.float32) + b1
    h = jnp.maximum(h, 0.0)

    w2 = m_ref[w2_off:w2_off + H1, 0:H2]            # (H1, H2)
    b2 = v_ref[b2_off:b2_off + 1, 0:H2]             # (1, H2) f32
    h = jnp.dot(h.astype(m_ref.dtype), w2,
                preferred_element_type=jnp.float32) + b2
    deep = jnp.maximum(h, 0.0)                      # (TB, H2) f32

    # ---- CrossNet (vector parameterization) -------------------------------
    # Elementwise math stays f32 on the VPU; the per-row xl . k_i dot is an
    # MXU (TB,D)@(D,1) column matmul instead of a VALU/XLU lane reduce.
    # TODO(synk): on v6e/v7x the elementwise cross ops could run in packed
    # bf16 for ~2x VALU throughput (not on v5e: no bf16 VALU); kept f32 here.
    cb = v_ref[cb_off:cb_off + L, 0:D]              # (L, D) f32
    x0 = xf
    xl = xf
    for i in range(L):                              # static unroll (L small)
        ko = k_offs[i]
        k_col = v_ref[ko:ko + D, 0:1]               # (D, 1) f32 column
        xl_w = jnp.dot(xl, k_col, preferred_element_type=jnp.float32)  # (TB,1)
        xl = x0 * xl_w + cb[i:i + 1, :] + xl
    cross = xl                                      # (TB, D) f32

    # ---- Output projection: no concat; two idle-MXU column matmuls replace
    # the two cross-lane reduce chains. --------------------------------------
    wc = v_ref[wc_off:wc_off + D, 0:1]              # (D, 1)  = wout[:D]
    wd = v_ref[wd_off:wd_off + H2, 0:1]             # (H2, 1) = wout[D:]
    logit = (jnp.dot(cross, wc, preferred_element_type=jnp.float32)
             + jnp.dot(deep, wd, preferred_element_type=jnp.float32))
    out_ref[...] = logit                            # (TB, 1) f32


# ---------------------------------------------------------------------------
# Host-side parameter packing (2 resident buffers instead of 8 tiny DMAs)
# ---------------------------------------------------------------------------
def pack_params(params, matmul_dtype=jnp.float32):
    w1, w2 = params["w1"], params["w2"]
    D, H1 = w1.shape
    H2 = w2.shape[1]
    L = params["ck"].shape[0]
    Hm = max(H1, H2)

    # Matmul-weight buffer (may be bf16). 16-row-aligned sections keep the
    # packed-dtype sublane tiles aligned for bf16.
    w2_off = _round_up(D, 16)
    m_rows = _round_up(w2_off + H1, 16)
    M = jnp.zeros((m_rows, Hm), matmul_dtype)
    M = M.at[0:D, 0:H1].set(w1.astype(matmul_dtype))
    M = M.at[w2_off:w2_off + H1, 0:H2].set(w2.astype(matmul_dtype))

    # f32 vector/column-parameter buffer, 8-row-aligned sections:
    #   row params:    b1 (1,H1), b2 (1,H2), cb (L,D)
    #   column params: cross kernels ck[i] and the wout split (wc, wd) stored
    #                  as lane-0 (D,1)/(H2,1) columns so they feed MXU dots.
    sections = [("b1", 1), ("b2", 1), ("cb", L)]
    sections += [(f"k{i}", D) for i in range(L)]
    sections += [("wc", D), ("wd", H2)]
    offs, cur = {}, 0
    for name, rows in sections:
        offs[name] = cur
        cur += _round_up(rows, 8)
    Wv = max(D, H1, H2)
    V = jnp.zeros((cur, Wv), jnp.float32)
    V = V.at[offs["b1"], 0:H1].set(params["b1"].reshape(H1))
    V = V.at[offs["b2"], 0:H2].set(params["b2"].reshape(H2))
    V = V.at[offs["cb"]:offs["cb"] + L, 0:D].set(params["cb"])
    for i in range(L):
        V = V.at[offs[f"k{i}"]:offs[f"k{i}"] + D, 0].set(params["ck"][i])
    V = V.at[offs["wc"]:offs["wc"] + D, 0].set(params["wout"][0:D, 0])
    V = V.at[offs["wd"]:offs["wd"] + H2, 0].set(params["wout"][D:D + H2, 0])

    dims = dict(D=D, H1=H1, H2=H2, L=L, w2_off=w2_off,
                b1_off=offs["b1"], b2_off=offs["b2"], cb_off=offs["cb"],
                k_offs=tuple(offs[f"k{i}"] for i in range(L)),
                wc_off=offs["wc"], wd_off=offs["wd"])
    return M, V, dims


# ---------------------------------------------------------------------------
# Wrapper
# ---------------------------------------------------------------------------
def dcn_forward(x, params, *, block_b=2048, matmul_dtype=jnp.float32,
                vmem_limit_bytes=None):
    """DCN forward. `x` may be f32 or bf16 (bf16 halves activation HBM traffic)."""
    B, D = x.shape
    M, V, dims = pack_params(params, matmul_dtype)

    # Batch tiling.  Real (lane-padded) VMEM cost: with D<=128 every f32
    # (tile_b, D/H) buffer pads to 128 lanes, i.e. tile_b*512 B each.  With
    # ~8-9 live intermediates (x, x0, xl, h, deep, cross, ...) plus the
    # double-buffered x input, tile_b=2048 uses ~8-9 MiB -- under v5e's 16 MiB
    # scoped-VMEM default and well under v6e/v7x's 32 MiB.  Past tile_b~4096
    # raise vmem_limit_bytes (v7x: do not exceed ~48 MiB of 64 MiB physical).
    b8 = _round_up(max(B, 1), 8)
    # Keep the grid at >= 2 steps whenever the batch allows it, so the
    # "parallel" batch axis actually feeds both TensorCores on v7x.
    tile_b = max(8, min(block_b, _round_up(pl.cdiv(b8, 2), 8)))
    grid = (pl.cdiv(B, tile_b),)

    # No host-side jnp.pad of x: Pallas boundary-block handling covers a
    # partial last tile; rows past B yield garbage logits that are never
    # written back to the (B, 1) output (all kernel ops are row-independent).
    kernel = functools.partial(dcn_kernel, dims=dims)

    return pl.pallas_call(
        kernel,
        out_shape=jax.ShapeDtypeStruct((B, 1), jnp.float32),
        grid=grid,
        in_specs=[
            # activations: one (tile_b, D) block per grid step (pipelined)
            pl.BlockSpec((tile_b, D), lambda t: (t, 0)),
            # packed weights: constant index_map -> fetched once, resident.
            # (pl.Buffered(1) single-buffering was considered; skipped since
            #  the duplicate buffer for these tens-of-KiB weights is noise.)
            pl.BlockSpec(M.shape, lambda t: (0, 0)),
            pl.BlockSpec(V.shape, lambda t: (0, 0)),
        ],
        # TODO(synk): a lane-dense (1, tile_b) output (one extra transpose)
        # would avoid masked (tile_b,1) stores; skipped as a secondary win.
        out_specs=pl.BlockSpec((tile_b, 1), lambda t: (t, 0)),
        compiler_params=pltpu.CompilerParams(
            dimension_semantics=("parallel",),      # dual-TC split on v7x
            vmem_limit_bytes=vmem_limit_bytes),
    )(x, M, V)


# ---------------------------------------------------------------------------
# Pure-JAX reference mirroring the PyTorch DCN.forward semantics
# (dropout p=0 and use_bn=False are identity and omitted).
# ---------------------------------------------------------------------------
def dcn_reference(x, p):
    h = jnp.maximum(x @ p["w1"] + p["b1"], 0.0)
    deep = jnp.maximum(h @ p["w2"] + p["b2"], 0.0)
    x0 = x
    xl = x
    for i in range(p["ck"].shape[0]):
        xl_w = jnp.sum(xl * p["ck"][i:i + 1, :], axis=-1, keepdims=True)
        xl = x0 * xl_w + p["cb"][i:i + 1, :] + xl
    stack = jnp.concatenate([xl, deep], axis=-1)
    return stack @ p["wout"]


if __name__ == "__main__":
    # Shapes consistent with the module's forward:
    #   node_embed_size=16 -> D = 48, dnn_hidden_units=[64, 64], cross_num=2
    node_embed_size = 16
    D = node_embed_size * 3
    H1, H2 = 64, 64
    cross_num = 2

    key = jax.random.PRNGKey(0)
    k_x, k_w1, k_b1, k_w2, k_b2, k_ck, k_cb, k_wo = jax.random.split(key, 8)

    # Non-zero biases so the packed-buffer offsets are actually exercised.
    params = {
        "w1": (1e-4 * jax.random.normal(k_w1, (D, H1))).astype(jnp.float32),
        "b1": (1e-2 * jax.random.normal(k_b1, (1, H1))).astype(jnp.float32),
        "w2": (1e-4 * jax.random.normal(k_w2, (H1, H2))).astype(jnp.float32),
        "b2": (1e-2 * jax.random.normal(k_b2, (1, H2))).astype(jnp.float32),
        "ck": (jnp.sqrt(2.0 / (D + 1))
               * jax.random.normal(k_ck, (cross_num, D))).astype(jnp.float32),
        "cb": (1e-2 * jax.random.normal(k_cb, (cross_num, D))).astype(jnp.float32),
        "wout": ((1.0 / jnp.sqrt(D + H2))
                 * jax.random.normal(k_wo, (D + H2, 1))).astype(jnp.float32),
    }

    # ---- small f32 batch ----------------------------------------------------
    B = 8
    x = jax.random.normal(k_x, (B, D), jnp.float32)
    ref = jax.block_until_ready(dcn_reference(x, params))
    out = jax.block_until_ready(dcn_forward(x, params))
    assert out.shape == (B, 1)
    # Tolerance slightly relaxed vs pure-VPU math: the cross/projection dots
    # now run as f32 MXU matmuls.
    np.testing.assert_allclose(np.asarray(out), np.asarray(ref),
                               rtol=1e-4, atol=1e-5)

    # ---- non-divisible batch, multi-step grid (no pad copy, boundary block) -
    B2 = 300
    x2 = jax.random.normal(k_x, (B2, D), jnp.float32)
    ref2 = jax.block_until_ready(dcn_reference(x2, params))
    out2 = jax.block_until_ready(dcn_forward(x2, params, block_b=128))
    assert out2.shape == (B2, 1)
    np.testing.assert_allclose(np.asarray(out2), np.asarray(ref2),
                               rtol=1e-4, atol=1e-5)

    # ---- bf16 path: bf16 weights + bf16 activation streaming ----------------
    # (halved x HBM traffic on v6e/v7x; CrossNet math stays f32 once in VMEM,
    #  so only the bf16 quantization of x / the DNN branch perturbs the logit).
    out_bf16 = jax.block_until_ready(
        dcn_forward(x.astype(jnp.bfloat16), params, matmul_dtype=jnp.bfloat16))
    np.testing.assert_allclose(np.asarray(out_bf16), np.asarray(ref),
                               rtol=5e-2, atol=5e-3)

    print("KERNEL_OK")
</pallas_src>

<mosaic_0001>
module attributes {stable_mosaic.version = 11 : i64} {
  func.func @dcn_kernel(%arg0: i32, %arg1: memref<8x48xf32, #tpu.memory_space<vmem>>, %arg2: memref<112x64xf32, #tpu.memory_space<vmem>>, %arg3: memref<232x64xf32, #tpu.memory_space<vmem>>, %arg4: memref<8x1xf32, #tpu.memory_space<vmem>>) attributes {dimension_semantics = [#tpu.dimension_semantics<parallel>], iteration_bounds = array<i64: 1>, scalar_prefetch = 0 : i64, scratch_operands = 0 : i64, tpu.core_type = #tpu.core_type<tc>, window_params = [{transform_indices = @transform_0, window_bounds = array<i64: 8, 48>}, {pipeline_mode = #tpu.pipeline_mode<synchronous>, transform_indices = @transform_1, window_bounds = array<i64: 112, 64>}, {pipeline_mode = #tpu.pipeline_mode<synchronous>, transform_indices = @transform_2, window_bounds = array<i64: 232, 64>}, {transform_indices = @transform_3, window_bounds = array<i64: 8, 1>}]} {
    %c0 = arith.constant 0 : index
    %c0_0 = arith.constant 0 : index
    %0 = vector.load %arg1[%c0, %c0_0] : memref<8x48xf32, #tpu.memory_space<vmem>>, vector<8x48xf32>
    %c0_1 = arith.constant 0 : index
    %c0_2 = arith.constant 0 : index
    %1 = vector.load %arg2[%c0_1, %c0_2] : memref<112x64xf32, #tpu.memory_space<vmem>>, vector<48x64xf32>
    %c0_3 = arith.constant 0 : index
    %c0_4 = arith.constant 0 : index
    %2 = vector.load %arg3[%c0_3, %c0_4] : memref<232x64xf32, #tpu.memory_space<vmem>>, vector<1x64xf32>
    %cst = arith.constant dense<0.000000e+00> : vector<8x64xf32>
    %3 = tpu.matmul %0, %1, %cst {dimension_numbers = #tpu.dot_dimension_numbers<[1], [0], [0], [1], [0, 0, 1, 1], [], []>} : vector<8x48xf32>, vector<48x64xf32>, vector<8x64xf32> -> vector<8x64xf32>
    %4 = vector.broadcast %2 : vector<1x64xf32> to vector<8x64xf32>
    %5 = arith.addf %3, %4 : vector<8x64xf32>
    %cst_5 = arith.constant 0.000000e+00 : f32
    %6 = vector.broadcast %cst_5 : f32 to vector<8x64xf32>
    %7 = arith.maximumf %5, %6 : vector<8x64xf32>
    %c48 = arith.constant 48 : index
    %c0_6 = arith.constant 0 : index
    %8 = vector.load %arg2[%c48, %c0_6] : memref<112x64xf32, #tpu.memory_space<vmem>>, vector<64x64xf32>
    %c8 = arith.constant 8 : index
    %c0_7 = arith.constant 0 : index
    %9 = vector.load %arg3[%c8, %c0_7] : memref<232x64xf32, #tpu.memory_space<vmem>>, vector<1x64xf32>
    %cst_8 = arith.constant dense<0.000000e+00> : vector<8x64xf32>
    %10 = tpu.matmul %7, %8, %cst_8 {dimension_numbers = #tpu.dot_dimension_numbers<[1], [0], [0], [1], [0, 0, 1, 1], [], []>} : vector<8x64xf32>, vector<64x64xf32>, vector<8x64xf32> -> vector<8x64xf32>
    %11 = vector.broadcast %9 : vector<1x64xf32> to vector<8x64xf32>
    %12 = arith.addf %10, %11 : vector<8x64xf32>
    %cst_9 = arith.constant 0.000000e+00 : f32
    %13 = vector.broadcast %cst_9 : f32 to vector<8x64xf32>
    %14 = arith.maximumf %12, %13 : vector<8x64xf32>
    %c16 = arith.constant 16 : index
    %c0_10 = arith.constant 0 : index
    %15 = vector.load %arg3[%c16, %c0_10] : memref<232x64xf32, #tpu.memory_space<vmem>>, vector<2x48xf32>
    %c24 = arith.constant 24 : index
    %c0_11 = arith.constant 0 : index
    %16 = vector.load %arg3[%c24, %c0_11] : memref<232x64xf32, #tpu.memory_space<vmem>>, vector<48x1xf32>
    %cst_12 = arith.constant dense<0.000000e+00> : vector<8x1xf32>
    %17 = tpu.matmul %0, %16, %cst_12 {dimension_numbers = #tpu.dot_dimension_numbers<[1], [0], [0], [1], [0, 0, 1, 1], [], []>} : vector<8x48xf32>, vector<48x1xf32>, vector<8x1xf32> -> vector<8x1xf32>
    %18 = vector.broadcast %17 : vector<8x1xf32> to vector<8x48xf32>
    %19 = arith.mulf %0, %18 : vector<8x48xf32>
    %20 = vector.extract_strided_slice %15 {offsets = [0, 0], sizes = [1, 48], strides = [1, 1]} : vector<2x48xf32> to vector<1x48xf32>
    %21 = vector.broadcast %20 : vector<1x48xf32> to vector<8x48xf32>
    %22 = arith.addf %19, %21 : vector<8x48xf32>
    %23 = arith.addf %22, %0 : vector<8x48xf32>
    %c72 = arith.constant 72 : index
    %c0_13 = arith.constant 0 : index
    %24 = vector.load %arg3[%c72, %c0_13] : memref<232x64xf32, #tpu.memory_space<vmem>>, vector<48x1xf32>
    %cst_14 = arith.constant dense<0.000000e+00> : vector<8x1xf32>
    %25 = tpu.matmul %23, %24, %cst_14 {dimension_numbers = #tpu.dot_dimension_numbers<[1], [0], [0], [1], [0, 0, 1, 1], [], []>} : vector<8x48xf32>, vector<48x1xf32>, vector<8x1xf32> -> vector<8x1xf32>
    %26 = vector.broadcast %25 : vector<8x1xf32> to vector<8x48xf32>
    %27 = arith.mulf %0, %26 : vector<8x48xf32>
    %28 = vector.extract_strided_slice %15 {offsets = [1, 0], sizes = [1, 48], strides = [1, 1]} : vector<2x48xf32> to vector<1x48xf32>
    %29 = vector.broadcast %28 : vector<1x48xf32> to vector<8x48xf32>
    %30 = arith.addf %27, %29 : vector<8x48xf32>
    %31 = arith.addf %30, %23 : vector<8x48xf32>
    %c120 = arith.constant 120 : index
    %c0_15 = arith.constant 0 : index
    %32 = vector.load %arg3[%c120, %c0_15] : memref<232x64xf32, #tpu.memory_space<vmem>>, vector<48x1xf32>
    %c168 = arith.constant 168 : index
    %c0_16 = arith.constant 0 : index
    %33 = vector.load %arg3[%c168, %c0_16] : memref<232x64xf32, #tpu.memory_space<vmem>>, vector<64x1xf32>
    %cst_17 = arith.constant dense<0.000000e+00> : vector<8x1xf32>
    %34 = tpu.matmul %31, %32, %cst_17 {dimension_numbers = #tpu.dot_dimension_numbers<[1], [0], [0], [1], [0, 0, 1, 1], [], []>} : vector<8x48xf32>, vector<48x1xf32>, vector<8x1xf32> -> vector<8x1xf32>
    %cst_18 = arith.constant dense<0.000000e+00> : vector<8x1xf32>
    %35 = tpu.matmul %14, %33, %cst_18 {dimension_numbers = #tpu.dot_dimension_numbers<[1], [0], [0], [1], [0, 0, 1, 1], [], []>} : vector<8x64xf32>, vector<64x1xf32>, vector<8x1xf32> -> vector<8x1xf32>
    %36 = arith.addf %34, %35 : vector<8x1xf32>
    %c0_19 = arith.constant 0 : index
    %c0_20 = arith.constant 0 : index
    %37 = vector.load %arg4[%c0_19, %c0_20] : memref<8x1xf32, #tpu.memory_space<vmem>>, vector<8x1xf32>
    tpu.vector_store %arg4[%c0_19, %c0_20], %36 {strides = array<i32>} : memref<8x1xf32, #tpu.memory_space<vmem>>, vector<8x1xf32>,
    return
  }
  func.func @transform_0(%arg0: i32) -> (i32, i32) {
    %c0_i32 = arith.constant 0 : i32
    %c0_i32_0 = arith.constant 0 : i32
    return %arg0, %c0_i32 : i32, i32
  }
  func.func @transform_1(%arg0: i32) -> (i32, i32) {
    %c0_i32 = arith.constant 0 : i32
    %c0_i32_0 = arith.constant 0 : i32
    %c0_i32_1 = arith.constant 0 : i32
    return %c0_i32, %c0_i32_0 : i32, i32
  }
  func.func @transform_2(%arg0: i32) -> (i32, i32) {
    %c0_i32 = arith.constant 0 : i32
    %c0_i32_0 = arith.constant 0 : i32
    %c0_i32_1 = arith.constant 0 : i32
    return %c0_i32, %c0_i32_0 : i32, i32
  }
  func.func @transform_3(%arg0: i32) -> (i32, i32) {
    %c0_i32 = arith.constant 0 : i32
    %c0_i32_0 = arith.constant 0 : i32
    return %arg0, %c0_i32 : i32, i32
  }
}

</mosaic_0001>

<bundles_post_ra>
// kernel: tpu_custom_call.1
= control target key start
LH: loop header
LB: loop body
LE: loop exit
PB: predicated region body
PF: predicated region fallthrough
CT: control target
= control target key end

     0   :  { %v691_v0 = vmov 0.0   ;;  %vm692_vm0 = vmmov 0   ;;  %vm26_vm1 = vcmask 392192   ;;  %v693_v22 = vmov 0   ;;  %s914_s1 = inlined_call_operand.vmem [shape: f32[112,64], index: 1, kind: input, shape index: {}]   ;;  %s915_s0 = inlined_call_operand.vmem [shape: f32[8,48], index: 0, kind: input, shape index: {}]   ;;  %s916_s2 = inlined_call_operand.vmem [shape: f32[232,64], index: 2, kind: input, shape index: {}]   ;;  %s917_s3 = inlined_call_operand.vmem [shape: f32[8,1], index: 3, kind: output, shape index: {}]  }
   0x1   :  { %589 = vmatprep.subr.mxu0 %v691_v0  ;;  %v20_v1 = vld [vmem:[%s914_s1 + $0x28] sm:$0xff]  ;;  %v19_v2 = vld [vmem:[%s914_s1 + $0x20] sm:$0xff]  ;;  %601 = vmatprep.mubr.msk.f32.mxu0 %vm692_vm0, %v691_v0  ;;  %v18_v3 = vld [vmem:[%s914_s1 + $0x18] sm:$0xff]  ;;  %vm114_vm2 = vcmask 523264   ;;  %v272_v44 = vlaneseq  ;;  %vm529_vm3 = vcmask 7168  }
   0x2   :  { %590 = vmatpush3.msra.mxu0 %v20_v1  ;;  %604 = vmatprep.subr.mxu1 %v691_v0  ;;  %v17_v4 = vld [vmem:[%s914_s1 + $0x10] sm:$0xff]  ;;  %v108_v5 = vld [vmem:[%s914_s1 + $0x68] sm:$0xff]  ;;  %v107_v6 = vld [vmem:[%s914_s1 + $0x60] sm:$0xff] }
   0x3   :  { %591 = vmatprep.subr.mxu0 %v691_v0  ;;  %620 = vmatprep.mubr.msk.f32.mxu1 %vm692_vm0, %v691_v0  ;;  %v16_v7 = vld [vmem:[%s914_s1 + $0x8] sm:$0xff]  ;;  %v106_v8 = vld [vmem:[%s914_s1 + $0x58] sm:$0xff]  ;;  %v15_v9 = vld [vmem:[%s914_s1] sm:$0xff]  ;;  %v273_v45 = vshrl.u32 %v272_v44, 7 }
   0x4   :  { %592 = vmatpush3.msra.mxu0 %v19_v2  ;;  %605 = vmatpush3.msra.mxu1 %v108_v5  ;;  %v105_v10 = vld [vmem:[%s914_s1 + $0x50] sm:$0xff]  ;;  %v759_v11 = vld [vmem:[%s915_s0] sm:$0xff]  ;;  %v194_v13 = vld [vmem:[%s916_s2 + $0x38] sm:$0xff] }
   0x5   :  { %593 = vmatprep.subr.mxu0 %v691_v0  ;;  %606 = vmatprep.subr.mxu1 %v691_v0  ;;  %v195_v12 = vld [vmem:[%s916_s2 + $0x40] sm:$0xff]  ;;  %v104_v14 = vld [vmem:[%s914_s1 + $0x48] sm:$0xff]  ;;  %v193_v15 = vld [vmem:[%s916_s2 + $0x30] sm:$0xff]  ;;  %v274_v46 = vsub.s32 0, %v273_v45  ;;  %v365_v5 = vsub.s32 1, %v273_v45 }
   0x6   :  { %594 = vmatpush3.msra.mxu0 %v18_v3  ;;  %607 = vmatpush3.msra.mxu1 %v107_v6  ;;  %v192_v16 = vld [vmem:[%s916_s2 + $0x28] sm:$0xff]  ;;  %v191_v17 = vld [vmem:[%s916_s2 + $0x20] sm:$0xff]  ;;  %v190_v18 = vld [vmem:[%s916_s2 + $0x18] sm:$0xff] }
   0x7   :  { %595 = vmatprep.subr.mxu0 %v691_v0  ;;  %608 = vmatprep.subr.mxu1 %v691_v0  ;;  %v103_v19 = vld [vmem:[%s914_s1 + $0x40] sm:$0xff]  ;;  %v102_v20 = vld [vmem:[%s914_s1 + $0x38] sm:$0xff]  ;;  %v101_v21 = vld [vmem:[%s914_s1 + $0x30] sm:$0xff] }
   0x8   :  { %596 = vmatpush3.msra.mxu0 %v17_v4  ;;  %609 = vmatpush3.msra.mxu1 %v106_v8  ;;  %v535_v23 = vld [vmem:[%s916_s2] ss:$0 sm:$0xff]  ;;  %v283_v28 = vld [vmem:[%s916_s2 + $0x70] sm:$0xff]  ;;  %v282_v29 = vld [vmem:[%s916_s2 + $0x68] sm:$0xff] }
   0x9   :  { %597 = vmatprep.subr.mxu0 %v691_v0  ;;  %610 = vmatprep.subr.mxu1 %v691_v0  ;;  %v281_v30 = vld [vmem:[%s916_s2 + $0x60] sm:$0xff]  ;;  %v280_v31 = vld [vmem:[%s916_s2 + $0x58] sm:$0xff]  ;;  %v279_v32 = vld [vmem:[%s916_s2 + $0x50] sm:$0xff] }
   0xa   :  { %598 = vmatpush3.msra.mxu0 %v16_v7  ;;  %611 = vmatpush3.msra.mxu1 %v105_v10  ;;  %v278_v34 = vld [vmem:[%s916_s2 + $0x48] sm:$0xff]  ;;  %v382_v36 = vld [vmem:[%s916_s2 + $0xe0] sm:$0xff]  ;;  %v381_v37 = vld [vmem:[%s916_s2 + $0xd8] sm:$0xff] }
   0xb   :  { %599 = vmatprep.subr.mxu0 %v691_v0  ;;  %612 = vmatprep.subr.mxu1 %v691_v0  ;;  %v380_v38 = vld [vmem:[%s916_s2 + $0xd0] sm:$0xff]  ;;  %v379_v39 = vld [vmem:[%s916_s2 + $0xc8] sm:$0xff]  ;;  %v378_v40 = vld [vmem:[%s916_s2 + $0xc0] sm:$0xff] }
   0xc   :  { %600 = vmatpush3.msra.mxu0 %v15_v9  ;;  %613 = vmatpush3.msra.mxu1 %v104_v14  ;;  %v377_v41 = vld [vmem:[%s916_s2 + $0xb8] sm:$0xff]  ;;  %v376_v42 = vld [vmem:[%s916_s2 + $0xb0] sm:$0xff]  ;;  %v375_v43 = vld [vmem:[%s916_s2 + $0xa8] sm:$0xff] }
   0xd   :  { %602 = vmatmul.mubr.msk.f32.vlgmr.msra.gmra.mxu0 %vm26_vm1, %v759_v11  ;;  %623 = vmatprep.subr.mxu0 %v691_v0  ;;  %v189_v47 = vld [vmem:[%s916_s2 + $0x10] sm:$0x3]  ;;  %v537_v53 = vld [vmem:[%s916_s2 + $0x8] ss:$0 sm:$0xff]  ;;  %v374_v58 = vld [vmem:[%s916_s2 + $0xa0] sm:$0xff] }
   0xe   :  { %624 = vmatpush3.msra.mxu0 %v195_v12  ;;  %635 = vmatprep.mubr.msk.f32.mxu0 %vm692_vm0, %v691_v0  ;;  %v275_v48 = vrot.slane %v189_v47, %v274_v46  ;;  %v373_v59 = vld [vmem:[%s916_s2 + $0x98] sm:$0xff]  ;;  %v372_v60 = vld [vmem:[%s916_s2 + $0x90] sm:$0xff]  ;;  %v371_v61 = vld [vmem:[%s916_s2 + $0x88] sm:$0xff]  ;;  %v366_v6 = vrot.slane %v189_v47, %v365_v5 }
   0xf   :  { %625 = vmatprep.subr.mxu0 %v691_v0  ;;  %614 = vmatprep.subr.mxu1 %v691_v0  ;;  %v370_v62 = vld [vmem:[%s916_s2 + $0x80] sm:$0xff]  ;;  %v369_v1 = vld [vmem:[%s916_s2 + $0x78] sm:$0xff] }
  0x10   :  { %626 = vmatpush3.msra.mxu0 %v194_v13  ;;  %615 = vmatpush3.msra.mxu1 %v103_v19 }
  0x11   :  { %627 = vmatprep.subr.mxu0 %v691_v0  ;;  %616 = vmatprep.subr.mxu1 %v691_v0 }
  0x12   :  { %628 = vmatpush3.msra.mxu0 %v193_v15  ;;  %617 = vmatpush3.msra.mxu1 %v102_v20 }
  0x13   :  { %629 = vmatprep.subr.mxu0 %v691_v0  ;;  %618 = vmatprep.subr.mxu1 %v691_v0 }
  0x14   :  { %630 = vmatpush3.msra.mxu0 %v192_v16  ;;  %619 = vmatpush3.msra.mxu1 %v101_v21 }
  0x15   :  { %631 = vmatprep.subr.mxu0 %v691_v0  ;;  %638 = vmatprep.subr.mxu1 %v691_v0 }
  0x16   :  { %632 = vmatpush3.msra.mxu0 %v191_v17  ;;  %690 = vset.pattern.permute.xlu0 %v693_v22 }
  0x17   :  { %633 = vmatprep.subr.mxu0 %v691_v0 }
  0x18   :  { %634 = vmatpush3.msra.mxu0 %v190_v18 }
  0x19   :  { %636 = vmatmul.mubr.msk.f32.vlgmr.msra.gmra.mxu0 %vm26_vm1, %v759_v11  ;;  %653 = vmatprep.subr.mxu0 %v691_v0 }
  0x1a   :  { %669 = vmatprep.mubr.msk.f32.mxu0 %vm692_vm0, %v691_v0  ;;  %654 = vmatpush3.msra.mxu0 %v382_v36 }
  0x1b   :  { %655 = vmatprep.subr.mxu0 %v691_v0 }
  0x1c   :  { %656 = vmatpush3.msra.mxu0 %v381_v37 }
  0x1d   :  { %657 = vmatprep.subr.mxu0 %v691_v0 }
  0x1e   :  { %658 = vmatpush3.msra.mxu0 %v380_v38 }
  0x1f   :  { %659 = vmatprep.subr.mxu0 %v691_v0 }
  0x20   :  { %660 = vmatpush3.msra.mxu0 %v379_v39 }
  0x21   :  { %661 = vmatprep.subr.mxu0 %v691_v0 }
  0x22   :  { %662 = vmatpush3.msra.mxu0 %v378_v40 }
  0x23   :  { %663 = vmatprep.subr.mxu0 %v691_v0 }
  0x24   :  { %664 = vmatpush3.msra.mxu0 %v377_v41 }
  0x25   :  { %665 = vmatprep.subr.mxu0 %v691_v0 }
  0x26   :  { %666 = vmatpush3.msra.mxu0 %v376_v42 }
  0x27   :  { %667 = vmatprep.subr.mxu0 %v691_v0 }
  0x28   :  { %668 = vmatpush3.msra.mxu0 %v375_v43 }
  0xcd   :  { %v96_v24 = vpop.f32.mrf.mxu0 }
  0xce   :  { %v97_v25 = vadd.f32 %v535_v23, %v96_v24 }
  0xcf   :  { %v603_v26 = vpop.f32.mrf.mxu0 }
  0xd0   :  { %v100_v27 = vmax.f32 %v97_v25, 0.0 }
  0xd2   :  { %621 = vmatmul.mubr.msk.f32.vlgmr.msra.gmra.mxu1 %vm114_vm2, %v100_v27 }
  0xd3   :  { %639 = vmatpush3.msra.mxu1 %v283_v28  ;;  %650 = vmatprep.mubr.msk.f32.mxu1 %vm692_vm0, %v691_v0 }
  0xd4   :  { %640 = vmatprep.subr.mxu1 %v691_v0 }
  0xd5   :  { %641 = vmatpush3.msra.mxu1 %v282_v29 }
  0xd6   :  { %642 = vmatprep.subr.mxu1 %v691_v0 }
  0xd7   :  { %643 = vmatpush3.msra.mxu1 %v281_v30 }
  0xd8   :  { %644 = vmatprep.subr.mxu1 %v691_v0 }
  0xd9   :  { %v262_v33 = vpop.f32.mrf.mxu0  ;;  %645 = vmatpush3.msra.mxu1 %v280_v31 }
  0xda   :  { %268 = vperm.xlu0 %690, %v262_v33   ;;  %646 = vmatprep.subr.mxu1 %v691_v0 }
  0xdb   :  { %v637_v35 = vpop.f32.mrf.mxu0  ;;  %647 = vmatpush3.msra.mxu1 %v279_v32 }
  0xdc   :  { %648 = vmatprep.subr.mxu1 %v691_v0 }
  0xdd   :  { %649 = vmatpush3.msra.mxu1 %v278_v34 }
  0xde   :  { %672 = vmatprep.subr.mxu1 %v691_v0 }
 0x155   :  { %v269_v49 = vpop.permute.xlu0 %268 }
 0x156   :  { %v271_v50 = vmul.f32 %v269_v49, %v759_v11 }
 0x158   :  { %v276_v51 = vadd.f32 %v275_v48, %v271_v50 }
 0x15a   :  { %v277_v52 = vadd.f32 %v276_v51, %v759_v11 }
 0x15c   :  { %651 = vmatmul.mubr.msk.f32.vlgmr.msra.gmra.mxu1 %vm26_vm1, %v277_v52 }
 0x15d   :  { %684 = vmatprep.mubr.msk.f32.mxu1 %vm692_vm0, %v691_v0  ;;  %673 = vmatpush3.msra.mxu1 %v374_v58 }
 0x15e   :  { %674 = vmatprep.subr.mxu1 %v691_v0 }
 0x15f   :  { %675 = vmatpush3.msra.mxu1 %v373_v59 }
 0x160   :  { %676 = vmatprep.subr.mxu1 %v691_v0 }
 0x161   :  { %677 = vmatpush3.msra.mxu1 %v372_v60 }
 0x162   :  { %678 = vmatprep.subr.mxu1 %v691_v0 }
 0x163   :  { %679 = vmatpush3.msra.mxu1 %v371_v61 }
 0x164   :  { %680 = vmatprep.subr.mxu1 %v691_v0 }
 0x165   :  { %681 = vmatpush3.msra.mxu1 %v370_v62 }
 0x166   :  { %682 = vmatprep.subr.mxu1 %v691_v0 }
 0x167   :  { %683 = vmatpush3.msra.mxu1 %v369_v1 }
 0x192   :  { %v184_v54 = vpop.f32.mrf.mxu1 }
 0x193   :  { %v185_v55 = vadd.f32 %v537_v53, %v184_v54 }
 0x194   :  { %v622_v56 = vpop.f32.mrf.mxu1 }
 0x195   :  { %v188_v57 = vmax.f32 %v185_v55, 0.0 }
 0x197   :  { %670 = vmatmul.mubr.msk.f32.vlgmr.msra.gmra.mxu0 %vm114_vm2, %v188_v57 }
 0x21c   :  { %v353_v63 = vpop.f32.mrf.mxu1 }
 0x21d   :  { %359 = vperm.xlu0 %690, %v353_v63  }
 0x21e   :  { %v652_v2 = vpop.f32.mrf.mxu1 }
 0x257   :  { %v452_v3 = vpop.f32.mrf.mxu0 }
 0x259   :  { %v671_v4 = vpop.f32.mrf.mxu0 }
 0x298   :  { %v360_v7 = vpop.permute.xlu0 %359 }
 0x299   :  { %v362_v8 = vmul.f32 %v360_v7, %v759_v11 }
 0x29b   :  { %v367_v9 = vadd.f32 %v366_v6, %v362_v8 }
 0x29d   :  { %v368_v10 = vadd.f32 %v367_v9, %v277_v52 }
 0x29f   :  { %685 = vmatmul.mubr.msk.f32.vlgmr.msra.gmra.mxu1 %vm26_vm1, %v368_v10 }
 0x35f   :  { %v525_v12 = vpop.f32.mrf.mxu1 }
 0x360   :  { %v526_v0 = vadd.f32 %v525_v12, %v452_v3 }
 0x361   :  { %v686_v13 = vpop.f32.mrf.mxu1 }
 0x362   :  { %530 = vst.msk [vmem:[%s917_s3] sm:$0xff] %vm529_vm3, %v526_v0 }

</bundles_post_ra>
